<compile_context>
chip_gen: v6e
topology: v6e:2x2x1
jax: 0.10.0
libtpu: 0.0.40
codegen_flags: <defaults>
</compile_context>

<pallas_src>
import jax
import jax.numpy as jnp
from jax.experimental import pallas as pl
from jax.experimental.pallas import tpu as pltpu


_MAX_LANES = 512                 # cap on lane (last-dim) width; multiple of 128
_TARGET_BYTES_PER_BUF = 4 << 20  # ~4 MiB per in/out VMEM buffer (roofline plateau)
_VMEM_LIMIT_BYTES = 32 << 20     # 2 bufs x 2-deep x 4 MiB = 16 MiB + headroom;
                                 # <= physical VMEM on v5e/v6e/v7x
_SMALL_INPUT_BYTES = 1 << 20     # below this, fused XLA elementwise beats a pallas_call


def _elementwise_kernel(x_ref, o_ref):
    # (x * 2 + 3) / 2 — kept in the reference op order (bit-exact; /2 is exact).
    t = x_ref[...]
    t = t * 2.0
    t = t + 3.0
    t = t / 2.0
    o_ref[...] = t


def _round_up(a, b):
    return ((a + b - 1) // b) * b


def _sublane(dtype):
    # Minimum sublane multiple per dtype width (f32/i32: 8, bf16: 16, int8/fp8: 32).
    return max(8, 32 // jnp.dtype(dtype).itemsize)


def _pick_lanes(total):
    # Largest multiple of 128 (<= _MAX_LANES) that divides total -> zero-copy reshape.
    for lanes in range(_MAX_LANES, 0, -128):
        if total % lanes == 0:
            return lanes, False
    return 128, True  # fall back: 128 lanes with a small tail pad


def pt_module_forward(x, *, min_pallas_bytes=_SMALL_INPUT_BYTES):
    """Per-batch (x[i]*2 + 3)/2, stacked == elementwise over the whole tensor."""
    orig_shape = x.shape
    dtype = x.dtype
    total = x.size
    itemsize = jnp.dtype(dtype).itemsize

    # Tiny tensors: launch/step overhead dominates; let XLA fuse the expression.
    if total * itemsize < min_pallas_bytes:
        return (x * 2.0 + 3.0) / 2.0

    lanes, needs_pad = _pick_lanes(total)
    flat = x.reshape(-1)
    if needs_pad:
        padded_total = _round_up(total, lanes)
        flat = jnp.pad(flat, (0, padded_total - total))
    else:
        padded_total = total
    rows = padded_total // lanes
    x2d = flat.reshape(rows, lanes)

    sub = _sublane(dtype)
    if rows <= sub:
        tm = rows  # single full-dim block (valid even if not a multiple of 8)
    else:
        target_rows = max(
            sub, (_TARGET_BYTES_PER_BUF // (lanes * itemsize)) // sub * sub
        )
        # Cap at ~half the rows so the grid has >= 2 steps -> v7x megacore gets
        # both TensorCores busy even on medium-sized inputs.
        half = _round_up(pl.cdiv(rows, 2), sub)
        tm = max(sub, min(target_rows, half))

    grid = (pl.cdiv(rows, tm),)  # partial last block is masked by Pallas

    cost = pl.CostEstimate(
        flops=3 * padded_total,
        transcendentals=0,
        bytes_accessed=2 * padded_total * itemsize,  # one read + one write (mem-bound)
    )

    out2d = pl.pallas_call(
        _elementwise_kernel,
        out_shape=jax.ShapeDtypeStruct((rows, lanes), dtype),
        grid_spec=pltpu.PrefetchScalarGridSpec(
            num_scalar_prefetch=0,
            grid=grid,
            in_specs=[pl.BlockSpec((tm, lanes), lambda i: (i, 0))],
            out_specs=pl.BlockSpec((tm, lanes), lambda i: (i, 0)),
        ),
        compiler_params=pltpu.CompilerParams(
            dimension_semantics=("parallel",),
            vmem_limit_bytes=_VMEM_LIMIT_BYTES,
        ),
        cost_estimate=cost,
    )(x2d)

    out = out2d.reshape(-1)
    if needs_pad:
        out = out[:total]
    return out.reshape(orig_shape)


if __name__ == "__main__":
    key = jax.random.PRNGKey(0)
    x = jax.random.normal(key, (2, 4, 16, 16), dtype=jnp.float32)
    y_ref = (x * 2.0 + 3.0) / 2.0

    # Default path: small input -> fused XLA fast path.
    y_fast = jax.block_until_ready(pt_module_forward(x))
    # Force the Pallas kernel path so the kernel is compiled and exercised.
    y_pallas = jax.block_until_ready(pt_module_forward(x, min_pallas_bytes=0))

    for y in (y_fast, y_pallas):
        assert y.shape == x.shape
        assert y.dtype == x.dtype
        assert jnp.allclose(y, y_ref, atol=1e-6, rtol=1e-6)

    # Extra sanity check: a shape whose row count does not divide the tile,
    # exercising the multi-step grid and the masked partial last block.
    key2 = jax.random.PRNGKey(0)
    x2 = jax.random.normal(key2, (3, 5, 16, 16), dtype=jnp.float32)
    y2 = jax.block_until_ready(pt_module_forward(x2, min_pallas_bytes=0))
    y2_ref = (x2 * 2.0 + 3.0) / 2.0
    assert y2.shape == x2.shape
    assert jnp.allclose(y2, y2_ref, atol=1e-6, rtol=1e-6)

    print("KERNEL_OK")
</pallas_src>

<mosaic_0001>
module attributes {stable_mosaic.version = 11 : i64} {
  func.func @_elementwise_kernel(%arg0: i32, %arg1: memref<4x512xf32, #tpu.memory_space<vmem>>, %arg2: memref<4x512xf32, #tpu.memory_space<vmem>>) attributes {dimension_semantics = [#tpu.dimension_semantics<parallel>], iteration_bounds = array<i64: 1>, scalar_prefetch = 0 : i64, scratch_operands = 0 : i64, tpu.core_type = #tpu.core_type<tc>, window_params = [{transform_indices = @transform_0, window_bounds = array<i64: 4, 512>}, {transform_indices = @transform_1, window_bounds = array<i64: 4, 512>}]} {
    %c0 = arith.constant 0 : index
    %c0_0 = arith.constant 0 : index
    %0 = vector.load %arg1[%c0, %c0_0] : memref<4x512xf32, #tpu.memory_space<vmem>>, vector<4x512xf32>
    %cst = arith.constant 2.000000e+00 : f32
    %1 = vector.broadcast %cst : f32 to vector<4x512xf32>
    %2 = arith.mulf %0, %1 : vector<4x512xf32>
    %cst_1 = arith.constant 3.000000e+00 : f32
    %3 = vector.broadcast %cst_1 : f32 to vector<4x512xf32>
    %4 = arith.addf %2, %3 : vector<4x512xf32>
    %cst_2 = arith.constant 2.000000e+00 : f32
    %5 = vector.broadcast %cst_2 : f32 to vector<4x512xf32>
    %6 = arith.divf %4, %5 : vector<4x512xf32>
    %c0_3 = arith.constant 0 : index
    %c0_4 = arith.constant 0 : index
    %7 = vector.load %arg2[%c0_3, %c0_4] : memref<4x512xf32, #tpu.memory_space<vmem>>, vector<4x512xf32>
    tpu.vector_store %arg2[%c0_3, %c0_4], %6 {strides = array<i32>} : memref<4x512xf32, #tpu.memory_space<vmem>>, vector<4x512xf32>,
    return
  }
  func.func @transform_0(%arg0: i32) -> (i32, i32) {
    %c0_i32 = arith.constant 0 : i32
    %c0_i32_0 = arith.constant 0 : i32
    return %arg0, %c0_i32 : i32, i32
  }
  func.func @transform_1(%arg0: i32) -> (i32, i32) {
    %c0_i32 = arith.constant 0 : i32
    %c0_i32_0 = arith.constant 0 : i32
    return %arg0, %c0_i32 : i32, i32
  }
}

</mosaic_0001>

<bundles_post_ra>
// kernel: tpu_custom_call.1
= control target key start
LH: loop header
LB: loop body
LE: loop exit
PB: predicated region body
PF: predicated region fallthrough
CT: control target
= control target key end

     0   :  { %6 = vsyncpa [#allocation3], 0  ;;  %s111_s0 = inlined_call_operand.hbm [shape: f32[4,512], index: 0, kind: input, shape index: {}]   ;;  %s112_s1 = inlined_call_operand.hbm [shape: f32[4,512], index: 1, kind: output, shape index: {}]  }
   0x1   :  { %7 = vsyncpa [#allocation4], 0  ;;  %s93_s6 = smov [#allocation2]  }
   0x2   :  { %s14_s7 = sshll.u32 %s93_s6, 4  ;;  %s15_s7 = int_to_ptr.vmem [resolvable:$true] %s14_s7 }
   0x3   :  { %s57_s8 = scalar_lea.vmem %s15_s7, 256  ;;  %p62_p1 = scmp.lt.s32.totalorder %s15_s7, %s15_s7 }
   0x4   :  { %p58_p0 = scmp.ne.s32.totalorder %s15_s7, %s57_s8  ;;  %p63_p2 = scmp.lt.s32.totalorder %s57_s8, %s57_s8 }
   0x6   :  { %p64_p3 = por %p63_p2, %p62_p1 }
   0x8   :  { %p65_p4 = pnand %p64_p3, %p58_p0 }
   0xa   :  { %68 = shalt.err (!%p65_p4)
}
   0xb   :  { %17 = dma.hbm_to_vmem [thread:$0]  %s111_s0, 256, %s15_s7, [#allocation3]  }
   0xc   :  { %89 = dma.done.wait [#allocation3], 256  }
   0xd   :  { %90 = vsyncadd [#allocation3], 4294967040  ;;  %v21_v0 = vld [vmem:[#allocation2] sm:$0xff]  ;;  %v22_v1 = vld [vmem:[#allocation2 + $0x8] sm:$0xff]  ;;  %s94_s11 = smov [#allocation5]  }
   0xe   :  { %v23_v2 = vmul.f32 2.0, %v21_v0  ;;  %v24_v3 = vmul.f32 2.0, %v22_v1  ;;  %s38_s12 = sshll.u32 %s94_s11, 4  ;;  %s39_s12 = int_to_ptr.vmem [resolvable:$true] %s38_s12 }
   0xf   :  { %s69_s13 = scalar_lea.vmem %s39_s12, 256  ;;  %p74_p6 = scmp.lt.s32.totalorder %s39_s12, %s39_s12 }
  0x10   :  { %v25_v4 = vadd.f32 3.0, %v23_v2  ;;  %v26_v5 = vadd.f32 3.0, %v24_v3  ;;  %p70_p5 = scmp.ne.s32.totalorder %s39_s12, %s69_s13  ;;  %p75_p7 = scmp.lt.s32.totalorder %s69_s13, %s69_s13 }
  0x12   :  { %v28_v6 = vmul.f32 0.5, %v25_v4  ;;  %v29_v7 = vmul.f32 0.5, %v26_v5  ;;  %p76_p8 = por %p75_p7, %p74_p6 }
  0x14   :  { %30 = vst [vmem:[#allocation5] sm:$0xff] %v28_v6  ;;  %31 = vst [vmem:[#allocation5 + $0x8] sm:$0xff] %v29_v7  ;;  %p77_p9 = pnand %p76_p8, %p70_p5 }
  0x16   :  { %80 = shalt.err (!%p77_p9)
}
  0x17   :  { %41 = dma.vmem_to_hbm [thread:$0]  %s39_s12, 256, %s112_s1, [#allocation4]  }
  0x18   :  { %91 = dma.done.wait [#allocation4], 256  }
  0x19   :  { %92 = vsyncadd [#allocation4], 4294967040 }
  0x1a   :  { %45 = vsyncpa [#allocation3], 1 }
  0x1b   :  { %46 = vsyncpa [#allocation4], 1 }

</bundles_post_ra>
